<compile_context>
chip_gen: v7x
topology: tpu7x:2x2x1
jax: 0.10.0
libtpu: 0.0.40
codegen_flags: <defaults>
</compile_context>

<pallas_src>
import math

import jax
import jax.numpy as jnp
from jax.experimental import pallas as pl
from jax.experimental.pallas import tpu as pltpu


def _round_up(x, m):
    return ((x + m - 1) // m) * m


def adapter_kernel(x_ref, w1_ref, b1_ref, w2_ref, b2_ref, o_ref):
    # x_ref: (tm, D) tile of input rows, native dtype (f32 or bf16).
    x = x_ref[...]
    # fc1 (native-dtype MXU operands, f32 accumulation) + bias + ReLU
    h = jnp.dot(x, w1_ref[...], preferred_element_type=jnp.float32)
    h = jnp.maximum(h + b1_ref[...], 0.0)
    # fc2: cast intermediate back to the weight dtype for the MXU
    h = h.astype(w2_ref.dtype)
    y = jnp.dot(h, w2_ref[...], preferred_element_type=jnp.float32) + b2_ref[...]
    # residual add in f32, store in output dtype
    o_ref[...] = (x.astype(jnp.float32) + y).astype(o_ref.dtype)


def adapter_forward(x, w1, b1, w2, b2, *, tm=1024,
                    vmem_limit_bytes=64 * 1024 * 1024):
    """x: (B, S, d_model) -> (B, S, d_model).

    w1: (d_model, bottleneck), b1: (bottleneck,),
    w2: (bottleneck, d_model), b2: (d_model,)
    (weights pre-transposed vs. torch.nn.Linear)."""
    B, S, D = x.shape
    Bn = w1.shape[1]
    N = B * S
    dtype = x.dtype

    # --- pad bottleneck to a lane-dense multiple of 128 (zeros are inert) ---
    Bn_pad = _round_up(max(Bn, 1), 128)
    if Bn_pad != Bn:
        w1 = jnp.pad(w1, ((0, 0), (0, Bn_pad - Bn)))
        b1 = jnp.pad(b1, (0, Bn_pad - Bn))
        w2 = jnp.pad(w2, ((0, Bn_pad - Bn), (0, 0)))

    # --- choose the row tile: big, multiple of 8, capped by (padded) N ------
    tm = max(8, min(int(tm), _round_up(N, 8)))
    tm = _round_up(tm, 8)
    N_pad = _round_up(N, tm)

    x2 = x.reshape(N, D)
    if N_pad != N:
        x2 = jnp.pad(x2, ((0, N_pad - N), (0, 0)))

    # Biases as (1, dim) f32 slabs (accumulate in f32).
    b1_2d = b1.reshape(1, Bn_pad).astype(jnp.float32)
    b2_2d = b2.reshape(1, D).astype(jnp.float32)

    itemsize = jnp.dtype(dtype).itemsize
    w_itemsize = jnp.dtype(w1.dtype).itemsize
    cost = pl.CostEstimate(
        flops=4 * N_pad * D * Bn_pad,                       # two matmuls
        transcendentals=0,
        bytes_accessed=(2 * N_pad * D * itemsize            # x in + out
                        + 2 * D * Bn_pad * w_itemsize       # W1, W2
                        + (Bn_pad + D) * 4),                # biases (f32)
    )

    out2 = pl.pallas_call(
        adapter_kernel,
        out_shape=jax.ShapeDtypeStruct((N_pad, D), dtype),
        grid_spec=pltpu.PrefetchScalarGridSpec(
            num_scalar_prefetch=0,
            grid=(N_pad // tm,),
            in_specs=[
                pl.BlockSpec((tm, D), lambda i: (i, 0)),        # x rows (tiled)
                pl.BlockSpec((D, Bn_pad), lambda i: (0, 0)),    # W1 (resident)
                pl.BlockSpec((1, Bn_pad), lambda i: (0, 0)),    # b1
                pl.BlockSpec((Bn_pad, D), lambda i: (0, 0)),    # W2 (resident)
                pl.BlockSpec((1, D), lambda i: (0, 0)),         # b2
            ],
            out_specs=pl.BlockSpec((tm, D), lambda i: (i, 0)),
        ),
        compiler_params=pltpu.CompilerParams(
            dimension_semantics=("parallel",),
            vmem_limit_bytes=vmem_limit_bytes,
        ),
        input_output_aliases={0: 0},
        cost_estimate=cost,
    )(x2, w1, b1_2d, w2, b2_2d)

    if N_pad != N:
        out2 = out2[:N]
    return out2.reshape(B, S, D)


def init_adapter_params(key, d_model, bottleneck, dtype=jnp.float32):
    """Deterministic init matching the torch module's __init__:
       - D_fc1.weight: kaiming_uniform_(a=sqrt(5)) -> U(-1/sqrt(fan_in), 1/sqrt(fan_in))
       - D_fc1.bias, D_fc2.weight, D_fc2.bias: zeros
       Weights stored transposed (in, out) relative to nn.Linear."""
    bound = 1.0 / math.sqrt(d_model)
    w1 = jax.random.uniform(key, (d_model, bottleneck), dtype,
                            minval=-bound, maxval=bound)
    b1 = jnp.zeros((bottleneck,), dtype)
    w2 = jnp.zeros((bottleneck, d_model), dtype)
    b2 = jnp.zeros((d_model,), dtype)
    return w1, b1, w2, b2


def adapter_reference(x, w1, b1, w2, b2):
    xf = x.astype(jnp.float32)
    h = jnp.maximum(xf @ w1.astype(jnp.float32) + b1.astype(jnp.float32), 0.0)
    y = h @ w2.astype(jnp.float32) + b2.astype(jnp.float32)
    return (xf + y).astype(x.dtype)


if __name__ == "__main__":
    key = jax.random.PRNGKey(0)
    kx, kw, k1, k2, k3, k4 = jax.random.split(key, 6)

    # ---- Test 1: module-faithful init (w2/b2 zero -> adapter starts as identity)
    B, S, d_model, bottleneck = 2, 8, 32, 8
    x = jax.random.normal(kx, (B, S, d_model), jnp.float32)
    w1, b1, w2, b2 = init_adapter_params(kw, d_model, bottleneck)
    out = jax.block_until_ready(adapter_forward(x, w1, b1, w2, b2))
    ref = adapter_reference(x, w1, b1, w2, b2)
    assert out.shape == x.shape and out.dtype == x.dtype
    assert jnp.allclose(out, ref, atol=1e-5, rtol=1e-5)

    # ---- Test 2: random params + ragged row count (exercises Bn / row padding)
    B2, S2 = 3, 5                                   # N = 15, not a multiple of 8
    x2 = jax.random.normal(k1, (B2, S2, d_model), jnp.float32)
    w1r = jax.random.normal(k2, (d_model, bottleneck), jnp.float32) * 0.1
    b1r = jax.random.normal(k3, (bottleneck,), jnp.float32) * 0.1
    w2r = jax.random.normal(k4, (bottleneck, d_model), jnp.float32) * 0.1
    b2r = jnp.linspace(-0.1, 0.1, d_model, dtype=jnp.float32)
    out2 = jax.block_until_ready(adapter_forward(x2, w1r, b1r, w2r, b2r))
    ref2 = adapter_reference(x2, w1r, b1r, w2r, b2r)
    assert out2.shape == x2.shape and out2.dtype == x2.dtype
    assert jnp.allclose(out2, ref2, atol=1e-5, rtol=1e-5)

    print("KERNEL_OK")
</pallas_src>

<mosaic_0001>
module attributes {stable_mosaic.version = 11 : i64} {
  func.func @adapter_kernel(%arg0: i32, %arg1: memref<16x32xf32, #tpu.memory_space<vmem>>, %arg2: memref<32x128xf32, #tpu.memory_space<vmem>>, %arg3: memref<1x128xf32, #tpu.memory_space<vmem>>, %arg4: memref<128x32xf32, #tpu.memory_space<vmem>>, %arg5: memref<1x32xf32, #tpu.memory_space<vmem>>, %arg6: memref<16x32xf32, #tpu.memory_space<vmem>>) attributes {dimension_semantics = [#tpu.dimension_semantics<parallel>], iteration_bounds = array<i64: 1>, scalar_prefetch = 0 : i64, scratch_operands = 0 : i64, tpu.core_type = #tpu.core_type<tc>, window_params = [{transform_indices = @transform_0, window_bounds = array<i64: 16, 32>}, {pipeline_mode = #tpu.pipeline_mode<synchronous>, transform_indices = @transform_1, window_bounds = array<i64: 32, 128>}, {pipeline_mode = #tpu.pipeline_mode<synchronous>, transform_indices = @transform_2, window_bounds = array<i64: 1, 128>}, {pipeline_mode = #tpu.pipeline_mode<synchronous>, transform_indices = @transform_3, window_bounds = array<i64: 128, 32>}, {pipeline_mode = #tpu.pipeline_mode<synchronous>, transform_indices = @transform_4, window_bounds = array<i64: 1, 32>}, {transform_indices = @transform_5, window_bounds = array<i64: 16, 32>}]} {
    %c0 = arith.constant 0 : index
    %c0_0 = arith.constant 0 : index
    %0 = vector.load %arg1[%c0, %c0_0] : memref<16x32xf32, #tpu.memory_space<vmem>>, vector<16x32xf32>
    %c0_1 = arith.constant 0 : index
    %c0_2 = arith.constant 0 : index
    %1 = vector.load %arg2[%c0_1, %c0_2] : memref<32x128xf32, #tpu.memory_space<vmem>>, vector<32x128xf32>
    %cst = arith.constant dense<0.000000e+00> : vector<16x128xf32>
    %2 = tpu.matmul %0, %1, %cst {dimension_numbers = #tpu.dot_dimension_numbers<[1], [0], [0], [1], [0, 0, 1, 1], [], []>} : vector<16x32xf32>, vector<32x128xf32>, vector<16x128xf32> -> vector<16x128xf32>
    %c0_3 = arith.constant 0 : index
    %c0_4 = arith.constant 0 : index
    %3 = vector.load %arg3[%c0_3, %c0_4] : memref<1x128xf32, #tpu.memory_space<vmem>>, vector<1x128xf32>
    %4 = vector.broadcast %3 : vector<1x128xf32> to vector<16x128xf32>
    %5 = arith.addf %2, %4 : vector<16x128xf32>
    %cst_5 = arith.constant 0.000000e+00 : f32
    %6 = vector.broadcast %cst_5 : f32 to vector<16x128xf32>
    %7 = arith.maximumf %5, %6 : vector<16x128xf32>
    %c0_6 = arith.constant 0 : index
    %c0_7 = arith.constant 0 : index
    %8 = vector.load %arg4[%c0_6, %c0_7] : memref<128x32xf32, #tpu.memory_space<vmem>>, vector<128x32xf32>
    %cst_8 = arith.constant dense<0.000000e+00> : vector<16x32xf32>
    %9 = tpu.matmul %7, %8, %cst_8 {dimension_numbers = #tpu.dot_dimension_numbers<[1], [0], [0], [1], [0, 0, 1, 1], [], []>} : vector<16x128xf32>, vector<128x32xf32>, vector<16x32xf32> -> vector<16x32xf32>
    %c0_9 = arith.constant 0 : index
    %c0_10 = arith.constant 0 : index
    %10 = vector.load %arg5[%c0_9, %c0_10] : memref<1x32xf32, #tpu.memory_space<vmem>>, vector<1x32xf32>
    %11 = vector.broadcast %10 : vector<1x32xf32> to vector<16x32xf32>
    %12 = arith.addf %9, %11 : vector<16x32xf32>
    %13 = arith.addf %0, %12 : vector<16x32xf32>
    %c0_11 = arith.constant 0 : index
    %c0_12 = arith.constant 0 : index
    %14 = vector.load %arg6[%c0_11, %c0_12] : memref<16x32xf32, #tpu.memory_space<vmem>>, vector<16x32xf32>
    tpu.vector_store %arg6[%c0_11, %c0_12], %13 {strides = array<i32>} : memref<16x32xf32, #tpu.memory_space<vmem>>, vector<16x32xf32>,
    return
  }
  func.func @transform_0(%arg0: i32) -> (i32, i32) {
    %c0_i32 = arith.constant 0 : i32
    %c0_i32_0 = arith.constant 0 : i32
    return %arg0, %c0_i32 : i32, i32
  }
  func.func @transform_1(%arg0: i32) -> (i32, i32) {
    %c0_i32 = arith.constant 0 : i32
    %c0_i32_0 = arith.constant 0 : i32
    %c0_i32_1 = arith.constant 0 : i32
    return %c0_i32, %c0_i32_0 : i32, i32
  }
  func.func @transform_2(%arg0: i32) -> (i32, i32) {
    %c0_i32 = arith.constant 0 : i32
    %c0_i32_0 = arith.constant 0 : i32
    %c0_i32_1 = arith.constant 0 : i32
    return %c0_i32, %c0_i32_0 : i32, i32
  }
  func.func @transform_3(%arg0: i32) -> (i32, i32) {
    %c0_i32 = arith.constant 0 : i32
    %c0_i32_0 = arith.constant 0 : i32
    %c0_i32_1 = arith.constant 0 : i32
    return %c0_i32, %c0_i32_0 : i32, i32
  }
  func.func @transform_4(%arg0: i32) -> (i32, i32) {
    %c0_i32 = arith.constant 0 : i32
    %c0_i32_0 = arith.constant 0 : i32
    %c0_i32_1 = arith.constant 0 : i32
    return %c0_i32, %c0_i32_0 : i32, i32
  }
  func.func @transform_5(%arg0: i32) -> (i32, i32) {
    %c0_i32 = arith.constant 0 : i32
    %c0_i32_0 = arith.constant 0 : i32
    return %arg0, %c0_i32 : i32, i32
  }
}

</mosaic_0001>

<bundles_post_ra>
// kernel: tpu_custom_call.1
= control target key start
LH: loop header
LB: loop body
LE: loop exit
PB: predicated region body
PF: predicated region fallthrough
CT: control target
= control target key end

     0   :  { %10 = vsyncpa [#allocation3], 0  ;;  %s702_s0 = inlined_call_operand.hbm [shape: f32[16,32], index: 0, kind: input, shape index: {}, may-alias: {0,5}]   ;;  %s703_s1 = inlined_call_operand.hbm [shape: f32[32,128], index: 1, kind: input, shape index: {}]   ;;  %s704_s2 = inlined_call_operand.hbm [shape: f32[1,128], index: 2, kind: input, shape index: {}]   ;;  %s705_s3 = inlined_call_operand.hbm [shape: f32[128,32], index: 3, kind: input, shape index: {}]   ;;  %s706_s4 = inlined_call_operand.hbm [shape: f32[1,32], index: 4, kind: input, shape index: {}]   ;;  %s707_s5 = inlined_call_operand.hbm [shape: f32[16,32], index: 5, kind: output, shape index: {}, may-alias: {0,5}]  }
   0x1   :  { %11 = vsyncpa [#allocation6], 0 }
   0x2   :  { %12 = vsyncpa [#allocation9], 0 }
   0x3   :  { %13 = vsyncpa [#allocation4], 0  ;;  %s565_s18 = smov [#allocation5]   ;;  %s566_s20 = smov [#allocation8]  }
   0x4   :  { %s31_s19 = sshll.u32 %s565_s18, 4  ;;  %s53_s21 = sshll.u32 %s566_s20, 4  ;;  %s32_s19 = int_to_ptr.vmem [resolvable:$true] %s31_s19  ;;  %s603_s21 = int_to_ptr.vmem [resolvable:$true] %s53_s21 }
   0x5   :  { %s425_s24 = scalar_lea.hbm %s703_s1, 512 }
   0x6   :  { %p426_p0 = scmp.ne.s32.totalorder %s703_s1, %s425_s24  ;;  %p429_p1 = scmp.lt.u32.totalorder %s425_s24, %s703_s1 }
   0x8   :  { %p431_p2 = pnand %p429_p1, %p426_p0 }
   0xa   :  { %434 = shalt.err (!%p431_p2)
}
   0xb   :  { %s435_s29 = scalar_lea.vmem %s32_s19, 512  ;;  %p440_p4 = scmp.lt.s32.totalorder %s32_s19, %s32_s19 }
   0xc   :  { %p436_p3 = scmp.ne.s32.totalorder %s32_s19, %s435_s29  ;;  %p441_p5 = scmp.lt.s32.totalorder %s435_s29, %s435_s29 }
   0xe   :  { %p442_p6 = por %p441_p5, %p440_p4 }
  0x10   :  { %p443_p7 = pnand %p442_p6, %p436_p3 }
  0x12   :  { %446 = shalt.err (!%p443_p7)
}
  0x13   :  { %s567_s30 = smov 128   ;;  %s568_s6 = smov 8  }
  0x14   :  { %37 = dma.hbm_to_vmem [thread:$0]  %s703_s1, 512, %s32_s19, [#allocation6], %s567_s30, %s567_s30, %s568_s6  }
  0x15   :  { %s447_s11 = scalar_lea.hbm %s705_s3, 2048 }
  0x16   :  { %p448_p8 = scmp.ne.s32.totalorder %s705_s3, %s447_s11  ;;  %p451_p9 = scmp.lt.u32.totalorder %s447_s11, %s705_s3 }
  0x18   :  { %p453_p10 = pnand %p451_p9, %p448_p8 }
  0x1a   :  { %456 = shalt.err (!%p453_p10)
}
  0x1b   :  { %s457_s16 = scalar_lea.vmem %s603_s21, 2048  ;;  %p462_p12 = scmp.lt.s32.totalorder %s603_s21, %s603_s21 }
  0x1c   :  { %p458_p11 = scmp.ne.s32.totalorder %s603_s21, %s457_s16  ;;  %p463_p13 = scmp.lt.s32.totalorder %s457_s16, %s457_s16 }
  0x1e   :  { %p464_p0 = por %p463_p13, %p462_p12 }
  0x20   :  { %p465_p1 = pnand %p464_p0, %p458_p11 }
  0x22   :  { %468 = shalt.err (!%p465_p1)
}
  0x23   :  { %59 = dma.hbm_to_vmem [thread:$0]  %s705_s3, 2048, %s603_s21, [#allocation9], %s567_s30, %s567_s30, %s568_s6  }
  0x24   :  { %s569_s18 = smov [#allocation2]   ;;  %s570_s20 = smov [#allocation7]  }
  0x25   :  { %s19_s19 = sshll.u32 %s569_s18, 4  ;;  %s44_s22 = sshll.u32 %s570_s20, 4  ;;  %s20_s19 = int_to_ptr.vmem [resolvable:$true] %s19_s19  ;;  %s45_s22 = int_to_ptr.vmem [resolvable:$true] %s44_s22 }
  0x26   :  { %s469_s25 = scalar_lea.hbm %s702_s0, 256 }
  0x27   :  { %p470_p2 = scmp.ne.s32.totalorder %s702_s0, %s469_s25  ;;  %p473_p3 = scmp.lt.u32.totalorder %s469_s25, %s702_s0 }
  0x29   :  { %p475_p4 = pnand %p473_p3, %p470_p2 }
  0x2b   :  { %478 = shalt.err (!%p475_p4)
}
  0x2c   :  { %s479_s3 = scalar_lea.vmem %s20_s19, 256  ;;  %p484_p6 = scmp.lt.s32.totalorder %s20_s19, %s20_s19 }
  0x2d   :  { %p480_p5 = scmp.ne.s32.totalorder %s20_s19, %s479_s3  ;;  %p485_p7 = scmp.lt.s32.totalorder %s479_s3, %s479_s3 }
  0x2f   :  { %p486_p8 = por %p485_p7, %p484_p6 }
  0x31   :  { %p487_p9 = pnand %p486_p8, %p480_p5 }
  0x33   :  { %490 = shalt.err (!%p487_p9)
}
  0x34   :  { %25 = dma.hbm_to_vmem [thread:$0]  %s702_s0, 256, %s20_s19, [#allocation3], %s567_s30, %s567_s30, %s568_s6  }
  0x35   :  { %s491_s10 = scalar_lea.hbm %s704_s2, 16 }
  0x36   :  { %p492_p10 = scmp.ne.s32.totalorder %s704_s2, %s491_s10  ;;  %p495_p11 = scmp.lt.u32.totalorder %s491_s10, %s704_s2 }
  0x38   :  { %p497_p12 = pnand %p495_p11, %p492_p10 }
  0x3a   :  { %500 = shalt.err (!%p497_p12)
}
  0x3b   :  { %s501_s15 = scalar_lea.vmem %s45_s22, 16  ;;  %s505_s16 = scalar_lea.vmem %s45_s22, 32 }
  0x3c   :  { %p502_p13 = scmp.ne.s32.totalorder %s45_s22, %s501_s15  ;;  %p506_p0 = scmp.lt.s32.totalorder %s45_s22, %s45_s22 }
  0x3d   :  { %p507_p1 = scmp.lt.s32.totalorder %s505_s16, %s501_s15 }
  0x3f   :  { %p508_p2 = por %p507_p1, %p506_p0 }
  0x41   :  { %p509_p3 = pnand %p508_p2, %p502_p13 }
  0x43   :  { %512 = shalt.err (!%p509_p3)
}
  0x44   :  { %47 = dma.hbm_to_vmem [thread:$0]  %s704_s2, 16, %s45_s22, [#allocation6]  }
  0x45   :  { %s571_s17 = smov [#allocation10]   ;;  %s513_s23 = scalar_lea.hbm %s706_s4, 16 }
  0x46   :  { %s66_s18 = sshll.u32 %s571_s17, 4  ;;  %p514_p4 = scmp.ne.s32.totalorder %s706_s4, %s513_s23  ;;  %s67_s18 = int_to_ptr.vmem [resolvable:$true] %s66_s18 }
  0x47   :  { %p517_p5 = scmp.lt.u32.totalorder %s513_s23, %s706_s4 }
  0x49   :  { %p519_p6 = pnand %p517_p5, %p514_p4 }
  0x4b   :  { %522 = shalt.err (!%p519_p6)
}
  0x4c   :  { %s523_s28 = scalar_lea.vmem %s67_s18, 16  ;;  %s527_s2 = scalar_lea.vmem %s67_s18, 32 }
  0x4d   :  { %p524_p7 = scmp.ne.s32.totalorder %s67_s18, %s523_s28  ;;  %p528_p8 = scmp.lt.s32.totalorder %s67_s18, %s67_s18 }
  0x4e   :  { %p529_p9 = scmp.lt.s32.totalorder %s527_s2, %s523_s28 }
  0x50   :  { %p530_p10 = por %p529_p9, %p528_p8 }
  0x52   :  { %p531_p11 = pnand %p530_p10, %p524_p7 }
  0x54   :  { %534 = shalt.err (!%p531_p11)
}
  0x55   :  { %69 = dma.hbm_to_vmem [thread:$0]  %s706_s4, 16, %s67_s18, [#allocation9]  }
  0x56   :  { %557 = dma.done.wait [#allocation3], 256  }
  0x57   :  { %558 = vsyncadd [#allocation3], 4294967040 }
  0x58   :  { %559 = dma.done.wait [#allocation6], 528  }
  0x59   :  { %560 = vsyncadd [#allocation6], 4294966768 }
  0x5a   :  { %561 = dma.done.wait [#allocation9], 2064  }
  0x5b   :  { %562 = vsyncadd [#allocation9], 4294965232  ;;  %vm98_vm0 = vcmask 261120   ;;  %v87_v0 = vld [vmem:[#allocation5] sm:$0xff]  ;;  %v88_v1 = vld [vmem:[#allocation5 + $0x8] sm:$0xff]  ;;  %s572_s4 = smov [#allocation11]  }
  0x5c   :  { %v89_v2 = vld [vmem:[#allocation5 + $0x10] sm:$0xff]  ;;  %v377_v3 = vpack.c.bf16 %v88_v1, %v87_v0  ;;  %v90_v4 = vld [vmem:[#allocation5 + $0x18] sm:$0xff]  ;;  %v182_v7 = vld [vmem:[#allocation8] sm:$0xff]  ;;  %s289_s3 = sshll.u32 %s572_s4, 4  ;;  %s290_s3 = int_to_ptr.vmem [resolvable:$true] %s289_s3 }
  0x5d   :  { %v679_v5 = vld [vmem:[#allocation2] sm:$0xff]  ;;  %v381_v6 = vpack.c.bf16 %v90_v4, %v89_v2  ;;  %v185_v11 = vld [vmem:[#allocation8 + $0x18] sm:$0xff]  ;;  %v186_v13 = vld [vmem:[#allocation8 + $0x20] sm:$0xff]  ;;  %s535_s21 = scalar_lea.vmem %s290_s3, 256  ;;  %p540_p13 = scmp.lt.s32.totalorder %s290_s3, %s290_s3 }
  0x5e   :  { %339 = vmatprep.mubr.msk.f32.mxu0 %vm98_vm0, %v679_v5  ;;  %v183_v8 = vld [vmem:[#allocation8 + $0x8] sm:$0xff]  ;;  %v184_v9 = vld [vmem:[#allocation8 + $0x10] sm:$0xff]  ;;  %378 = vmatprep.subr.bf16.mxu0 %v377_v3  ;;  %v189_v18 = vld [vmem:[#allocation8 + $0x38] sm:$0xff]  ;;  %p536_p12 = scmp.ne.s32.totalorder %s290_s3, %s535_s21  ;;  %p541_p0 = scmp.lt.s32.totalorder %s535_s21, %s535_s21 }
  0x5f   :  { %v385_v10 = vpack.c.bf16 %v183_v8, %v182_v7  ;;  %380 = vmatpush3.bf16.msra.mxu0 %v377_v3  ;;  %v389_v12 = vpack.c.bf16 %v185_v11, %v184_v9  ;;  %v187_v14 = vld [vmem:[#allocation8 + $0x28] sm:$0xff]  ;;  %v86_v16 = vld [vmem:[#allocation2 + $0x8] sm:$0xff]  ;;  %v190_v20 = vld [vmem:[#allocation8 + $0x40] sm:$0xff] }
  0x60   :  { %382 = vmatprep.subr.bf16.mxu0 %v381_v6  ;;  %v393_v15 = vpack.c.bf16 %v187_v14, %v186_v13  ;;  %v188_v17 = vld [vmem:[#allocation8 + $0x30] sm:$0xff]  ;;  %v191_v21 = vld [vmem:[#allocation8 + $0x48] sm:$0xff]  ;;  %v193_v24 = vld [vmem:[#allocation8 + $0x58] sm:$0xff]  ;;  %p542_p1 = por %p541_p0, %p540_p13 }
  0x61   :  { %386 = vmatprep.subr.bf16.mxu1 %v385_v10  ;;  %v397_v19 = vpack.c.bf16 %v189_v18, %v188_v17  ;;  %v401_v22 = vpack.c.bf16 %v191_v21, %v190_v20  ;;  %v192_v23 = vld [vmem:[#allocation8 + $0x50] sm:$0xff]  ;;  %v194_v26 = vld [vmem:[#allocation8 + $0x60] sm:$0xff]  ;;  %v195_v27 = vld [vmem:[#allocation8 + $0x68] sm:$0xff] }
  0x62   :  { %388 = vmatpush3.bf16.msra.mxu1 %v385_v10  ;;  %v405_v25 = vpack.c.bf16 %v193_v24, %v192_v23  ;;  %v409_v28 = vpack.c.bf16 %v195_v27, %v194_v26  ;;  %v196_v29 = vld [vmem:[#allocation8 + $0x70] sm:$0xff]  ;;  %v197_v30 = vld [vmem:[#allocation8 + $0x78] sm:$0xff]  ;;  %v306_v39 = vld [vmem:[#allocation10] ss:$0 sm:$0xff]  ;;  %p543_p2 = pnand %p542_p1, %p536_p12 }
  0x63   :  { %390 = vmatprep.subr.bf16.mxu1 %v389_v12  ;;  %384 = vmatpush3.bf16.msra.mxu0 %v381_v6  ;;  %v413_v31 = vpack.c.bf16 %v197_v30, %v196_v29  ;;  %v303_v32 = vld [vmem:[#allocation7] ss:$0 sm:$0xff] }
  0x66   :  { %392 = vmatpush3.bf16.msra.mxu1 %v389_v12  ;;  %340 = vmatmul.mubr.msk.f32.vlgmr.msra.gmra.mrb[0].mxu0 %vm98_vm0, %v86_v16 }
  0x67   :  { %394 = vmatprep.subr.bf16.mxu1 %v393_v15 }
  0x6a   :  { %396 = vmatpush3.bf16.msra.mxu1 %v393_v15 }
  0x6b   :  { %398 = vmatprep.subr.bf16.mxu1 %v397_v19 }
  0x6e   :  { %400 = vmatpush3.bf16.msra.mxu1 %v397_v19 }
  0x6f   :  { %402 = vmatprep.subr.bf16.mxu1 %v401_v22 }
  0x72   :  { %404 = vmatpush3.bf16.msra.mxu1 %v401_v22 }
  0x73   :  { %406 = vmatprep.subr.bf16.mxu1 %v405_v25 }
  0x76   :  { %408 = vmatpush3.bf16.msra.mxu1 %v405_v25 }
  0x77   :  { %410 = vmatprep.subr.bf16.mxu1 %v409_v28 }
  0x7a   :  { %412 = vmatpush3.bf16.msra.mxu1 %v409_v28 }
  0x7b   :  { %414 = vmatprep.subr.bf16.mxu1 %v413_v31 }
  0x7e   :  { %416 = vmatpush3.bf16.msra.mxu1 %v413_v31 }
 0x139   :  { %v341_v33 = vpop.f32.mrb[0].mxu0 }
 0x13a   :  { %v177_v34 = vadd.f32 %v341_v33, %v303_v32  ;;  %v171_v35 = vpop.f32.mrb[1].mxu0 }
 0x13b   :  { %v172_v36 = vadd.f32 %v303_v32, %v171_v35 }
 0x13c   :  { %v181_v38 = vmax.f32 %v177_v34, 0.0 }
 0x13d   :  { %v180_v37 = vmax.f32 %v172_v36, 0.0 }
 0x13f   :  { %374 = vmatprep.mubr.f32.mxu1 %v180_v37 }
 0x140   :  { %375 = vmatmul.mubr.f32.vlgmr.msra.gmra.mrb[0].mxu1 %v181_v38 }
 0x213   :  { %v376_v40 = vpop.f32.mrb[0].mxu1 }
 0x214   :  { %v277_v41 = vadd.f32 %v376_v40, %v306_v39  ;;  %v271_v42 = vpop.f32.mrb[1].mxu1 }
 0x215   :  { %v272_v43 = vadd.f32 %v306_v39, %v271_v42 }
 0x216   :  { %v281_v44 = vadd.f32 %v277_v41, %v86_v16 }
 0x217   :  { %v280_v45 = vadd.f32 %v272_v43, %v679_v5 }
 0x218   :  { %283 = vst.msk [vmem:[#allocation11 + $0x8] sm:$0xff] %vm98_vm0, %v281_v44 }
 0x219   :  { %282 = vst.msk [vmem:[#allocation11] sm:$0xff] %vm98_vm0, %v280_v45 }
 0x21a   :  { %546 = shalt.err (!%p543_p2)
}
 0x21b   :  { %s547_s9 = scalar_lea.hbm %s707_s5, 256 }
 0x21c   :  { %p548_p3 = scmp.ne.s32.totalorder %s707_s5, %s547_s9  ;;  %p551_p4 = scmp.lt.u32.totalorder %s547_s9, %s707_s5 }
 0x21e   :  { %p553_p5 = pnand %p551_p4, %p548_p3 }
 0x220   :  { %556 = shalt.err (!%p553_p5)
}
 0x221   :  { %295 = dma.vmem_to_hbm [thread:$0]  %s290_s3, 256, %s707_s5, [#allocation4], %s567_s30, %s567_s30, %s568_s6  }
 0x222   :  { %563 = dma.done.wait [#allocation4], 256  }
 0x223   :  { %564 = vsyncadd [#allocation4], 4294967040 }
 0x224   :  { %299 = vsyncpa [#allocation3], 1 }
 0x225   :  { %300 = vsyncpa [#allocation6], 1 }
 0x226   :  { %301 = vsyncpa [#allocation9], 1 }
 0x227   :  { %302 = vsyncpa [#allocation4], 1 }

</bundles_post_ra>
